<compile_context>
chip_gen: v6e
topology: v6e:2x2x1
jax: 0.10.0
libtpu: 0.0.40
codegen_flags: <defaults>
</compile_context>

<pallas_src>
import numpy as np
import jax
import jax.numpy as jnp
from jax.experimental import pallas as pl
from jax.experimental.pallas import tpu as pltpu


# ----------------------------------------------------------------------------
# Host-side precomputation (replicates ConvertPanorama.__init__ / _intersection)
# ----------------------------------------------------------------------------
def _rodrigues(rvec):
    """cv2.Rodrigues replacement: rotation vector -> rotation matrix."""
    theta = float(np.linalg.norm(rvec))
    if theta < 1e-12:
        return np.eye(3)
    k = np.asarray(rvec, dtype=np.float64) / theta
    Kx = np.array([[0.0, -k[2], k[1]],
                   [k[2], 0.0, -k[0]],
                   [-k[1], k[0], 0.0]])
    return np.eye(3) + np.sin(theta) * Kx + (1.0 - np.cos(theta)) * (Kx @ Kx)


def build_mapping(equ_h, equ_w, cube_length):
    """Per-panorama-pixel cube-face index and (x, y) sampling coordinates."""
    L = cube_length
    delta_theta = np.pi / 2
    theta = (np.arange(equ_w) / (equ_w - 1) - 0.5) * 2 * np.pi + delta_theta
    phi = (np.arange(equ_h) / (equ_h - 1) - 0.5) * np.pi
    theta, phi = np.meshgrid(theta, phi)
    x = np.sin(theta) * np.cos(phi)
    y = np.sin(phi)
    z = np.cos(theta) * np.cos(phi)
    xyz = np.stack([x, y, z], axis=-1)

    planes = np.array([[0, 0, 1, 1], [0, 1, 0, -1], [0, 0, 1, -1],
                       [1, 0, 0, 1], [1, 0, 0, -1], [0, 1, 0, 1]],
                      dtype=np.float64)
    r_lst = np.array([[0, 1, 0], [0.5, 0, 0], [0, 0, 0],
                      [0, 0.5, 0], [0, -0.5, 0], [-0.5, 0, 0]]) * np.pi
    K = np.array([[L / 2, 0, (L - 1) / 2.0],
                  [0, L / 2, (L - 1) / 2.0],
                  [0, 0, 1]])
    R_lst = [_rodrigues(r) for r in r_lst]

    abc = planes[:, :-1]
    with np.errstate(divide="ignore", invalid="ignore"):
        depth = -planes[:, 3][None, None, :] / np.dot(xyz, abc.T)
    depth[depth < 0] = np.inf
    arg = np.argmin(depth, axis=-1)
    depth_min = np.min(depth, axis=-1)
    pts = depth_min[..., None] * xyz

    xy = np.zeros((equ_h, equ_w, 2), dtype=np.float64)
    for i in range(6):
        m = arg == i
        proj = pts[m].reshape(-1, 3) @ R_lst[i].T @ K.T
        xy[m] = np.clip(proj[:, :2] / proj[:, 2:], 0, L - 1)
    return arg, xy


def build_sampling_matrix(face, xy, cube_length):
    """Fold face selection + bilinear grid_sample(align_corners=True) into a
    dense matrix W of shape (P, F): out_pixel_p = sum_f W[p, f] * face_pixel_f."""
    L = cube_length
    H, Wd = face.shape
    P = H * Wd
    F = 6 * L * L
    f = face.reshape(-1).astype(np.int64)
    ix = xy[..., 0].reshape(-1)
    iy = xy[..., 1].reshape(-1)
    # Replicate the normalize / unnormalize round-trip done in forward().
    gx = (ix / (L - 1) - 0.5) * 2.0
    gy = (iy / (L - 1) - 0.5) * 2.0
    ix = (gx + 1.0) * 0.5 * (L - 1)
    iy = (gy + 1.0) * 0.5 * (L - 1)

    x0 = np.floor(ix).astype(np.int64)
    y0 = np.floor(iy).astype(np.int64)
    wx1 = ix - x0
    wy1 = iy - y0

    def inb(v):  # zero-padding: out-of-bounds corners contribute 0
        return ((v >= 0) & (v <= L - 1)).astype(np.float64)

    w00 = (1 - wy1) * (1 - wx1) * inb(y0) * inb(x0)
    w01 = (1 - wy1) * wx1 * inb(y0) * inb(x0 + 1)
    w10 = wy1 * (1 - wx1) * inb(y0 + 1) * inb(x0)
    w11 = wy1 * wx1 * inb(y0 + 1) * inb(x0 + 1)

    x0c = np.clip(x0, 0, L - 1)
    y0c = np.clip(y0, 0, L - 1)
    x1c = np.clip(x0 + 1, 0, L - 1)
    y1c = np.clip(y0 + 1, 0, L - 1)

    base = f * L * L
    p = np.arange(P)
    Wm = np.zeros((P, F), dtype=np.float32)
    np.add.at(Wm, (p, base + y0c * L + x0c), w00)
    np.add.at(Wm, (p, base + y0c * L + x1c), w01)
    np.add.at(Wm, (p, base + y1c * L + x0c), w10)
    np.add.at(Wm, (p, base + y1c * L + x1c), w11)
    return Wm


# ----------------------------------------------------------------------------
# Plan: pad W, pick tiles, build block-sparsity tables, convert W to bf16.
# ----------------------------------------------------------------------------
def _round_up(x, m):
    return ((x + m - 1) // m) * m


def _build_block_sparsity(wt_pad, tf, tn):
    """Per-N-tile list of nonzero K-block indices (padded with repeats)."""
    F_pad, P_pad = wt_pad.shape
    kb = F_pad // tf
    nb = P_pad // tn
    blk = wt_pad.reshape(kb, tf, nb, tn)
    nz = np.abs(blk).sum(axis=(1, 3)) > 0           # (kb, nb)
    nnz = nz.sum(axis=0).astype(np.int32)           # (nb,)
    k_steps = max(int(nnz.max()), 1)
    kidx = np.zeros((nb, k_steps), dtype=np.int32)
    for j in range(nb):
        ks = np.nonzero(nz[:, j])[0]
        if len(ks) > 0:
            kidx[j, :len(ks)] = ks
            kidx[j, len(ks):] = ks[-1]              # repeat last -> no extra DMA
    return kidx.reshape(-1), nnz, k_steps


def prepare_panorama(equ_h, equ_w, cube_length, *, tf_max=512, tn_max=2048):
    """Build the constant mapping once; returns everything the kernel needs."""
    assert tf_max % 128 == 0 and tn_max % 128 == 0
    face, xy = build_mapping(equ_h, equ_w, cube_length)
    Wm = build_sampling_matrix(face, xy, cube_length)   # (P, F) f32
    P, F = Wm.shape
    wt = Wm.T                                            # (F, P)

    tf = min(tf_max, _round_up(F, 128))
    tn = min(tn_max, _round_up(P, 128))
    F_pad = _round_up(F, tf)
    P_pad = _round_up(P, tn)
    wt_pad = np.zeros((F_pad, P_pad), dtype=np.float32)
    wt_pad[:F, :P] = wt
    kidx, nnz, k_steps = _build_block_sparsity(wt_pad, tf, tn)

    return dict(
        wt=jnp.asarray(wt_pad, dtype=jnp.bfloat16),      # streamed in bf16
        kidx=jnp.asarray(kidx, dtype=jnp.int32),         # (nb*k_steps,) flat
        nnz=jnp.asarray(nnz, dtype=jnp.int32),           # (nb,)
        k_steps=k_steps, tf=tf, tn=tn,
        F=F, F_pad=F_pad, P=P, P_pad=P_pad,
        equ_h=equ_h, equ_w=equ_w, cube_length=cube_length)


# ----------------------------------------------------------------------------
# Pallas kernel: block-sparse bf16 matmul  out (M, P) = A (M, F) @ Wt (F, P)
# ----------------------------------------------------------------------------
def _pano_matmul_kernel(kidx_ref, nnz_ref, a_ref, w_ref, o_ref):
    j = pl.program_id(1)
    k = pl.program_id(2)

    @pl.when(k == 0)
    def _init():
        o_ref[...] = jnp.zeros_like(o_ref)

    # Skip padded K steps (beyond this N-tile's nonzero K-block count).
    @pl.when(k < nnz_ref[j])
    def _acc():
        o_ref[...] += jnp.dot(a_ref[...], w_ref[...],
                              preferred_element_type=jnp.float32)


def pano_matmul(a, plan, *, tm_max=256):
    """a: (M, F) array -> (M, P) f32, using the precomputed plan."""
    assert tm_max % 8 == 0
    M, F = a.shape
    assert F == plan['F']
    tf, tn, k_steps = plan['tf'], plan['tn'], plan['k_steps']
    F_pad, P_pad = plan['F_pad'], plan['P_pad']

    tm = min(tm_max, _round_up(M, 8))
    M_pad = _round_up(M, tm)

    a = a.astype(jnp.bfloat16)
    if (M_pad, F_pad) != (M, F):
        a = jnp.pad(a, ((0, M_pad - M), (0, F_pad - F)))

    grid = (M_pad // tm, P_pad // tn, k_steps)

    out = pl.pallas_call(
        _pano_matmul_kernel,
        out_shape=jax.ShapeDtypeStruct((M_pad, P_pad), jnp.float32),
        grid_spec=pltpu.PrefetchScalarGridSpec(
            num_scalar_prefetch=2,
            grid=grid,
            in_specs=[
                pl.BlockSpec((tm, tf),
                             lambda i, j, k, kidx, nnz:
                             (i, kidx[j * k_steps + k])),
                pl.BlockSpec((tf, tn),
                             lambda i, j, k, kidx, nnz:
                             (kidx[j * k_steps + k], j)),
            ],
            out_specs=pl.BlockSpec((tm, tn),
                                   lambda i, j, k, kidx, nnz: (i, j)),
        ),
        compiler_params=pltpu.CompilerParams(
            dimension_semantics=("parallel", "parallel", "arbitrary")),
    )(plan['kidx'], plan['nnz'], a, plan['wt'])

    return out[:M, :plan['P']]


# ----------------------------------------------------------------------------
# Forward wrapper (glue: NCHW reshape/transpose + output reshape)
# ----------------------------------------------------------------------------
def convert_panorama_forward(x, plan):
    """x: (6*B, C, L, L) float32 (NCHW) -> equi: (B, C, equ_h, equ_w) f32."""
    L = plan['cube_length']
    six_b, C, Lh, Lw = x.shape
    assert six_b % 6 == 0 and Lh == L and Lw == L
    B = six_b // 6
    # x[6*b + i] is face i of panorama b.
    xf = x.reshape(B, 6, C, L, L)
    a = jnp.transpose(xf, (0, 2, 1, 3, 4)).reshape(B * C, 6 * L * L)
    out = pano_matmul(a, plan)                       # (B*C, P) f32
    return out.reshape(B, C, plan['equ_h'], plan['equ_w'])


# ----------------------------------------------------------------------------
if __name__ == "__main__":
    EQU_H, EQU_W, CUBE_L = 16, 32, 8
    B, C = 2, 4

    key = jax.random.PRNGKey(0)
    x = jax.random.normal(key, (6 * B, C, CUBE_L, CUBE_L), dtype=jnp.float32)

    # Default plan (production-style tiles; single K/N block at this toy size).
    plan = prepare_panorama(EQU_H, EQU_W, CUBE_L)
    out = jax.block_until_ready(convert_panorama_forward(x, plan))
    assert out.shape == (B, C, EQU_H, EQU_W)

    # Second plan with deliberately small tiles to exercise F/P zero-padding
    # and the block-sparse K-skip path.
    plan_small = prepare_panorama(EQU_H, EQU_W, CUBE_L, tf_max=256, tn_max=384)
    out_small = jax.block_until_ready(convert_panorama_forward(x, plan_small))
    assert out_small.shape == (B, C, EQU_H, EQU_W)

    # Independent NumPy reference: direct per-pixel bilinear gather (f64).
    face, xy = build_mapping(EQU_H, EQU_W, CUBE_L)
    xn = np.asarray(x).reshape(B, 6, C, CUBE_L, CUBE_L)
    xn2 = np.transpose(xn, (1, 3, 4, 0, 2))          # (6, L, L, B, C)
    f = face.reshape(-1)
    ixv = xy[..., 0].reshape(-1)
    iyv = xy[..., 1].reshape(-1)
    x0 = np.floor(ixv).astype(int)
    y0 = np.floor(iyv).astype(int)
    x1 = np.minimum(x0 + 1, CUBE_L - 1)
    y1 = np.minimum(y0 + 1, CUBE_L - 1)
    wx = (ixv - x0)[:, None, None]
    wy = (iyv - y0)[:, None, None]
    v00 = xn2[f, y0, x0]
    v01 = xn2[f, y0, x1]
    v10 = xn2[f, y1, x0]
    v11 = xn2[f, y1, x1]
    ref = ((1 - wy) * (1 - wx) * v00 + (1 - wy) * wx * v01
           + wy * (1 - wx) * v10 + wy * wx * v11)    # (P, B, C)
    ref = np.transpose(ref, (1, 2, 0)).reshape(B, C, EQU_H, EQU_W).astype(np.float32)

    # bf16 storage of A and W -> relaxed tolerance (f32 accumulation on MXU).
    np.testing.assert_allclose(np.asarray(out), ref, rtol=2e-2, atol=3e-2)
    np.testing.assert_allclose(np.asarray(out_small), ref, rtol=2e-2, atol=3e-2)

    print("KERNEL_OK")
</pallas_src>

<mosaic_0001>
module attributes {stable_mosaic.version = 11 : i64} {
  func.func @_pano_matmul_kernel(%arg0: i32, %arg1: i32, %arg2: i32, %arg3: memref<1xi32, #tpu.memory_space<smem>>, %arg4: memref<1xi32, #tpu.memory_space<smem>>, %arg5: memref<8x384xbf16, #tpu.memory_space<vmem>>, %arg6: memref<384x512xbf16, #tpu.memory_space<vmem>>, %arg7: memref<8x512xf32, #tpu.memory_space<vmem>>) attributes {dimension_semantics = [#tpu.dimension_semantics<parallel>, #tpu.dimension_semantics<parallel>, #tpu.dimension_semantics<arbitrary>], iteration_bounds = array<i64: 1, 1, 1>, scalar_prefetch = 2 : i64, scratch_operands = 0 : i64, tpu.core_type = #tpu.core_type<tc>, window_params = [{transform_indices = @transform_0, window_bounds = array<i64: 8, 384>}, {transform_indices = @transform_1, window_bounds = array<i64: 384, 512>}, {transform_indices = @transform_2, window_bounds = array<i64: 8, 512>}]} {
    %c0_i32 = arith.constant 0 : i32
    %0 = arith.cmpi eq, %arg2, %c0_i32 : i32
    %1 = arith.extui %0 : i1 to i32
    %c0_i32_0 = arith.constant 0 : i32
    %2 = arith.cmpi ne, %1, %c0_i32_0 : i32
    scf.if %2 {
      %cst = arith.constant 0.000000e+00 : f32
      %8 = vector.broadcast %cst : f32 to vector<8x512xf32>
      %c0 = arith.constant 0 : index
      %c0_2 = arith.constant 0 : index
      %9 = vector.load %arg7[%c0, %c0_2] : memref<8x512xf32, #tpu.memory_space<vmem>>, vector<8x512xf32>
      tpu.vector_store %arg7[%c0, %c0_2], %8 {strides = array<i32>} : memref<8x512xf32, #tpu.memory_space<vmem>>, vector<8x512xf32>,
    } else {
    }
    %3 = arith.index_cast %arg1 : i32 to index
    %4 = memref.load %arg4[%3] : memref<1xi32, #tpu.memory_space<smem>>
    %5 = arith.cmpi slt, %arg2, %4 : i32
    %6 = arith.extui %5 : i1 to i32
    %c0_i32_1 = arith.constant 0 : i32
    %7 = arith.cmpi ne, %6, %c0_i32_1 : i32
    scf.if %7 {
      %c0 = arith.constant 0 : index
      %c0_2 = arith.constant 0 : index
      %8 = vector.load %arg7[%c0, %c0_2] : memref<8x512xf32, #tpu.memory_space<vmem>>, vector<8x512xf32>
      %c0_3 = arith.constant 0 : index
      %c0_4 = arith.constant 0 : index
      %9 = vector.load %arg5[%c0_3, %c0_4] : memref<8x384xbf16, #tpu.memory_space<vmem>>, vector<8x384xbf16>
      %c0_5 = arith.constant 0 : index
      %c0_6 = arith.constant 0 : index
      %10 = vector.load %arg6[%c0_5, %c0_6] : memref<384x512xbf16, #tpu.memory_space<vmem>>, vector<384x512xbf16>
      %cst = arith.constant dense<0.000000e+00> : vector<8x512xf32>
      %11 = tpu.matmul %9, %10, %cst {dimension_numbers = #tpu.dot_dimension_numbers<[1], [0], [0], [1], [0, 0, 1, 1], [], []>} : vector<8x384xbf16>, vector<384x512xbf16>, vector<8x512xf32> -> vector<8x512xf32>
      %12 = arith.addf %8, %11 : vector<8x512xf32>
      %c0_7 = arith.constant 0 : index
      %c0_8 = arith.constant 0 : index
      %13 = vector.load %arg7[%c0_7, %c0_8] : memref<8x512xf32, #tpu.memory_space<vmem>>, vector<8x512xf32>
      tpu.vector_store %arg7[%c0_7, %c0_8], %12 {strides = array<i32>} : memref<8x512xf32, #tpu.memory_space<vmem>>, vector<8x512xf32>,
    } else {
    }
    return
  }
  func.func @transform_0(%arg0: i32, %arg1: i32, %arg2: i32, %arg3: memref<1xi32, #tpu.memory_space<smem>>, %arg4: memref<1xi32, #tpu.memory_space<smem>>) -> (i32, i32) {
    %c1_i32 = arith.constant 1 : i32
    %0 = arith.muli %arg1, %c1_i32 : i32
    %1 = arith.addi %0, %arg2 : i32
    %2 = arith.index_cast %1 : i32 to index
    %3 = memref.load %arg3[%2] : memref<1xi32, #tpu.memory_space<smem>>
    %c0_i32 = arith.constant 0 : i32
    return %arg0, %3 : i32, i32
  }
  func.func @transform_1(%arg0: i32, %arg1: i32, %arg2: i32, %arg3: memref<1xi32, #tpu.memory_space<smem>>, %arg4: memref<1xi32, #tpu.memory_space<smem>>) -> (i32, i32) {
    %c1_i32 = arith.constant 1 : i32
    %0 = arith.muli %arg1, %c1_i32 : i32
    %1 = arith.addi %0, %arg2 : i32
    %2 = arith.index_cast %1 : i32 to index
    %3 = memref.load %arg3[%2] : memref<1xi32, #tpu.memory_space<smem>>
    %c0_i32 = arith.constant 0 : i32
    return %3, %arg1 : i32, i32
  }
  func.func @transform_2(%arg0: i32, %arg1: i32, %arg2: i32, %arg3: memref<1xi32, #tpu.memory_space<smem>>, %arg4: memref<1xi32, #tpu.memory_space<smem>>) -> (i32, i32) {
    %c0_i32 = arith.constant 0 : i32
    return %arg0, %arg1 : i32, i32
  }
}

</mosaic_0001>

<bundles_post_ra>
// kernel: tpu_custom_call.1
= control target key start
LH: loop header
LB: loop body
LE: loop exit
PB: predicated region body
PF: predicated region fallthrough
CT: control target
= control target key end

     0   :  { %11 = vsyncpa [#allocation6], 0  ;;  %s1262_s0 = inlined_call_operand.<no memory space> [shape: s32[1], index: 0, kind: input, shape index: {}]   ;;  %s1263_s1 = inlined_call_operand.<no memory space> [shape: s32[1], index: 1, kind: input, shape index: {}]   ;;  %s1264_s2 = inlined_call_operand.hbm [shape: bf16[8,384], index: 2, kind: input, shape index: {}]   ;;  %s1265_s3 = inlined_call_operand.hbm [shape: bf16[384,512], index: 3, kind: input, shape index: {}]   ;;  %s1266_s4 = inlined_call_operand.hbm [shape: f32[8,512], index: 4, kind: output, shape index: {}]  }
   0x1   :  { %12 = vsyncpa [#allocation9], 0 }
   0x2   :  { %13 = vsyncpa [#allocation7], 0  ;;  %s962_s17 = smul.u32 192, %s1262_s0  ;;  %s1190_s18 = smov [#allocation5]  }
   0x3   :  { %s25_s19 = sshll.u32 %s1190_s18, 4  ;;  %s965_s22 = smul.u32 12288, %s1262_s0  ;;  %s26_s19 = int_to_ptr.vmem [resolvable:$true] %s25_s19 }
   0x4   :  { %s23_s25 = scalar_lea.hbm %s1264_s2, %s962_s17  ;;  %s1122_s29 = scalar_lea.hbm %s1264_s2, 192 }
   0x5   :  { %s1120_s26 = scalar_lea.hbm %s23_s25, 192  ;;  %p1123_p1 = scmp.lt.s32.totalorder %s23_s25, %s1264_s2 }
   0x6   :  { %p1121_p0 = scmp.ne.s32.totalorder %s23_s25, %s1120_s26  ;;  %p1124_p2 = scmp.lt.s32.totalorder %s1122_s29, %s1120_s26 }
   0x8   :  { %p1125_p3 = por %p1124_p2, %p1123_p1 }
   0xa   :  { %p1126_p4 = pnand %p1125_p3, %p1121_p0 }
   0xc   :  { %1129 = shalt.err (!%p1126_p4)
}
   0xd   :  { %s1130_s0 = scalar_lea.vmem %s26_s19, 192  ;;  %p1135_p6 = scmp.lt.s32.totalorder %s26_s19, %s26_s19 }
   0xe   :  { %p1131_p5 = scmp.ne.s32.totalorder %s26_s19, %s1130_s0  ;;  %p1136_p7 = scmp.lt.s32.totalorder %s1130_s0, %s1130_s0 }
  0x10   :  { %p1137_p8 = por %p1136_p7, %p1135_p6 }
  0x12   :  { %p1138_p9 = pnand %p1137_p8, %p1131_p5 }
  0x14   :  { %1141 = shalt.err (!%p1138_p9)
}
  0x15   :  { %28 = dma.hbm_to_vmem [thread:$0]  %s23_s25, 192, %s26_s19, [#allocation6]  }
  0x16   :  { %s39_s8 = scalar_lea.hbm %s1265_s3, %s965_s22  ;;  %s1191_s9 = smov [#allocation8]  }
  0x17   :  { %s40_s10 = sshll.u32 %s1191_s9, 4  ;;  %s1142_s2 = scalar_lea.hbm %s39_s8, 12288  ;;  %s41_s10 = int_to_ptr.vmem [resolvable:$true] %s40_s10 }
  0x18   :  { %p1143_p10 = scmp.ne.s32.totalorder %s39_s8, %s1142_s2  ;;  %s1144_s13 = scalar_lea.hbm %s1265_s3, 12288 }
  0x19   :  { %p1145_p11 = scmp.lt.s32.totalorder %s39_s8, %s1265_s3  ;;  %p1146_p12 = scmp.lt.s32.totalorder %s1144_s13, %s1142_s2 }
  0x1b   :  { %p1147_p13 = por %p1146_p12, %p1145_p11 }
  0x1d   :  { %p1148_p0 = pnand %p1147_p13, %p1143_p10 }
  0x1f   :  { %1151 = shalt.err (!%p1148_p0)
}
  0x20   :  { %s1152_s16 = scalar_lea.vmem %s41_s10, 12288  ;;  %p1157_p2 = scmp.lt.s32.totalorder %s41_s10, %s41_s10 }
  0x21   :  { %p1153_p1 = scmp.ne.s32.totalorder %s41_s10, %s1152_s16  ;;  %p1158_p3 = scmp.lt.s32.totalorder %s1152_s16, %s1152_s16 }
  0x23   :  { %p1159_p4 = por %p1158_p3, %p1157_p2 }
  0x25   :  { %p1160_p5 = pnand %p1159_p4, %p1153_p1 }
  0x27   :  { %1163 = shalt.err (!%p1160_p5)
}
  0x28   :  { %s1192_s17 = smov 256   ;;  %s1193_s18 = smov 16  }
  0x29   :  { %46 = dma.hbm_to_vmem [thread:$0]  %s39_s8, 12288, %s41_s10, [#allocation9], %s1192_s17, %s1192_s17, %s1193_s18  }
  0x2a   :  { %1184 = dma.done.wait [#allocation6], 192  }
  0x2b   :  { %1185 = vsyncadd [#allocation6], 4294967104 }
  0x2c   :  { %1186 = dma.done.wait [#allocation9], 12288  }
  0x2d   :  { %1187 = vsyncadd [#allocation9], 4294955008  ;;  %v1194_v0 = vmov 0.0   ;;  %p862_p6 = scmp.le.s32.totalorder %s1263_s1, 0 }
  0x2e   :  { %64 = vst [vmem:[#allocation10] sm:$0xff] %v1194_v0  ;;  %65 = vst [vmem:[#allocation10 + $0x8] sm:$0xff] %v1194_v0 }
  0x2f   :  { %66 = vst [vmem:[#allocation10 + $0x10] sm:$0xff] %v1194_v0  ;;  %67 = vst [vmem:[#allocation10 + $0x18] sm:$0xff] %v1194_v0  ;;  %72 = sbr.rel (%p862_p6) target bundleno = 350 (0x15e), region = 25 }
  0x34   :  { %v973_v1 = vld [vmem:[#allocation8 + $0xe4] ss:$16 sps:$4 sm:$0xff]   ;;  %v1195_v3 = vmov 0   ;;  %v977_v4 = vld [vmem:[#allocation8 + $0xe0] ss:$16 sps:$4 sm:$0xff]  }
  0x35   :  { %v975_v2 = vld [vmem:[#allocation8 + $0x2e4] ss:$16 sps:$4 sm:$0xff]   ;;  %739 = vmatprep.mubr.bf16.mxu1 %v1195_v3  ;;  %666 = vmatprep.subr.bf16.mxu0 %v973_v1  ;;  %v978_v5 = vld [vmem:[#allocation8 + $0x2e0] ss:$16 sps:$4 sm:$0xff]   ;;  %v1026_v35 = vld [vmem:[#allocation8 + $0xec] ss:$16 sps:$4 sm:$0xff]  }
  0x36   :  { %707 = vmatprep.subr.bf16.mxu1 %v975_v2  ;;  %v979_v6 = vld [vmem:[#allocation8 + $0xc4] ss:$16 sps:$4 sm:$0xff]   ;;  %667 = vmatpush1.bf16.msra.mxu0 %v977_v4  ;;  %v983_v8 = vld [vmem:[#allocation8 + $0xc0] ss:$16 sps:$4 sm:$0xff]   ;;  %v1250_v36 = vld [vmem:[#allocation5 + $0x8] ss:$0 sps:$4 sm:$0xff]  }
  0x37   :  { %708 = vmatpush1.bf16.msra.mxu1 %v978_v5  ;;  %v981_v7 = vld [vmem:[#allocation8 + $0x2c4] ss:$16 sps:$4 sm:$0xff]   ;;  %668 = vmatprep.subr.bf16.mxu0 %v979_v6  ;;  %v984_v9 = vld [vmem:[#allocation8 + $0x2c0] ss:$16 sps:$4 sm:$0xff]   ;;  %v1024_v37 = vld [vmem:[#allocation8 + $0xe8] ss:$16 sps:$4 sm:$0xff]  }
  0x38   :  { %709 = vmatprep.subr.bf16.mxu1 %v981_v7  ;;  %v985_v10 = vld [vmem:[#allocation8 + $0xa4] ss:$16 sps:$4 sm:$0xff]   ;;  %v989_v12 = vld [vmem:[#allocation8 + $0xa0] ss:$16 sps:$4 sm:$0xff]   ;;  %v1032_v40 = vld [vmem:[#allocation8 + $0xcc] ss:$16 sps:$4 sm:$0xff]  }
  0x39   :  { %v987_v11 = vld [vmem:[#allocation8 + $0x2a4] ss:$16 sps:$4 sm:$0xff]   ;;  %v990_v13 = vld [vmem:[#allocation8 + $0x2a0] ss:$16 sps:$4 sm:$0xff]   ;;  %v1030_v41 = vld [vmem:[#allocation8 + $0xc8] ss:$16 sps:$4 sm:$0xff]  }
  0x3a   :  { %669 = vmatpush1.bf16.msra.mxu0 %v983_v8  ;;  %v991_v14 = vld [vmem:[#allocation8 + $0x84] ss:$16 sps:$4 sm:$0xff]   ;;  %v995_v16 = vld [vmem:[#allocation8 + $0x80] ss:$16 sps:$4 sm:$0xff]   ;;  %v1038_v44 = vld [vmem:[#allocation8 + $0xac] ss:$16 sps:$4 sm:$0xff]  }
  0x3b   :  { %710 = vmatpush1.bf16.msra.mxu1 %v984_v9  ;;  %670 = vmatprep.subr.bf16.mxu0 %v985_v10  ;;  %v993_v15 = vld [vmem:[#allocation8 + $0x284] ss:$16 sps:$4 sm:$0xff]   ;;  %v996_v17 = vld [vmem:[#allocation8 + $0x280] ss:$16 sps:$4 sm:$0xff]   ;;  %v1036_v45 = vld [vmem:[#allocation8 + $0xa8] ss:$16 sps:$4 sm:$0xff]  }
  0x3c   :  { %711 = vmatprep.subr.bf16.mxu1 %v987_v11  ;;  %v997_v18 = vld [vmem:[#allocation8 + $0x64] ss:$16 sps:$4 sm:$0xff]   ;;  %v1001_v20 = vld [vmem:[#allocation8 + $0x60] ss:$16 sps:$4 sm:$0xff]   ;;  %v1044_v48 = vld [vmem:[#allocation8 + $0x8c] ss:$16 sps:$4 sm:$0xff]  }
  0x3d   :  { %v999_v19 = vld [vmem:[#allocation8 + $0x264] ss:$16 sps:$4 sm:$0xff]   ;;  %v1002_v21 = vld [vmem:[#allocation8 + $0x260] ss:$16 sps:$4 sm:$0xff]   ;;  %v1042_v49 = vld [vmem:[#allocation8 + $0x88] ss:$16 sps:$4 sm:$0xff]  }
  0x3e   :  { %671 = vmatpush1.bf16.msra.mxu0 %v989_v12  ;;  %v1003_v22 = vld [vmem:[#allocation8 + $0x44] ss:$16 sps:$4 sm:$0xff]   ;;  %v1007_v24 = vld [vmem:[#allocation8 + $0x40] ss:$16 sps:$4 sm:$0xff]   ;;  %v1050_v54 = vld [vmem:[#allocation8 + $0x6c] ss:$16 sps:$4 sm:$0xff]  }
  0x3f   :  { %712 = vmatpush1.bf16.msra.mxu1 %v990_v13  ;;  %672 = vmatprep.subr.bf16.mxu0 %v991_v14  ;;  %v1005_v23 = vld [vmem:[#allocation8 + $0x244] ss:$16 sps:$4 sm:$0xff]   ;;  %v1008_v25 = vld [vmem:[#allocation8 + $0x240] ss:$16 sps:$4 sm:$0xff]   ;;  %v1048_v55 = vld [vmem:[#allocation8 + $0x68] ss:$16 sps:$4 sm:$0xff]  }
  0x40   :  { %713 = vmatprep.subr.bf16.mxu1 %v993_v15  ;;  %v1009_v26 = vld [vmem:[#allocation8 + $0x24] ss:$16 sps:$4 sm:$0xff]   ;;  %v1013_v28 = vld [vmem:[#allocation8 + $0x20] ss:$16 sps:$4 sm:$0xff]   ;;  %v1056_v58 = vld [vmem:[#allocation8 + $0x4c] ss:$16 sps:$4 sm:$0xff]  }
  0x41   :  { %v1011_v27 = vld [vmem:[#allocation8 + $0x224] ss:$16 sps:$4 sm:$0xff]   ;;  %v1014_v29 = vld [vmem:[#allocation8 + $0x220] ss:$16 sps:$4 sm:$0xff]   ;;  %v1054_v59 = vld [vmem:[#allocation8 + $0x48] ss:$16 sps:$4 sm:$0xff]  }
  0x42   :  { %673 = vmatpush1.bf16.msra.mxu0 %v995_v16  ;;  %v1015_v30 = vld [vmem:[#allocation8 + $0x4] ss:$16 sps:$4 sm:$0xff]   ;;  %v1019_v32 = vld [vmem:[#allocation8] ss:$16 sps:$4 sm:$0xff]   ;;  %v1062_v62 = vld [vmem:[#allocation8 + $0x2c] ss:$16 sps:$4 sm:$0xff]  }
  0x43   :  { %714 = vmatpush1.bf16.msra.mxu1 %v996_v17  ;;  %674 = vmatprep.subr.bf16.mxu0 %v997_v18  ;;  %v1017_v31 = vld [vmem:[#allocation8 + $0x204] ss:$16 sps:$4 sm:$0xff]   ;;  %v1020_v33 = vld [vmem:[#allocation8 + $0x200] ss:$16 sps:$4 sm:$0xff]   ;;  %v1060_v63 = vld [vmem:[#allocation8 + $0x28] ss:$16 sps:$4 sm:$0xff]  }
  0x44   :  { %715 = vmatprep.subr.bf16.mxu1 %v999_v19  ;;  %v1021_v34 = vld [vmem:[#allocation8 + $0x1e4] ss:$16 sps:$4 sm:$0xff]   ;;  %v1027_v38 = vld [vmem:[#allocation8 + $0x1e0] ss:$16 sps:$4 sm:$0xff]   ;;  %v1068_v2 = vld [vmem:[#allocation8 + $0xc] ss:$16 sps:$4 sm:$0xff]  }
  0x45   :  { %v1028_v39 = vld [vmem:[#allocation8 + $0x1c4] ss:$16 sps:$4 sm:$0xff]   ;;  %v1033_v42 = vld [vmem:[#allocation8 + $0x1c0] ss:$16 sps:$4 sm:$0xff]   ;;  %v1066_v4 = vld [vmem:[#allocation8 + $0x8] ss:$16 sps:$4 sm:$0xff]  }
  0x46   :  { %675 = vmatpush1.bf16.msra.mxu0 %v1001_v20  ;;  %v1034_v43 = vld [vmem:[#allocation8 + $0x1a4] ss:$16 sps:$4 sm:$0xff]   ;;  %v1039_v46 = vld [vmem:[#allocation8 + $0x1a0] ss:$16 sps:$4 sm:$0xff]   ;;  %v1074_v6 = vld [vmem:[#allocation8 + $0x1ec] ss:$16 sps:$4 sm:$0xff]  }
  0x47   :  { %716 = vmatpush1.bf16.msra.mxu1 %v1002_v21  ;;  %676 = vmatprep.subr.bf16.mxu0 %v1003_v22  ;;  %v1040_v47 = vld [vmem:[#allocation8 + $0x184] ss:$16 sps:$4 sm:$0xff]   ;;  %v1045_v51 = vld [vmem:[#allocation8 + $0x180] ss:$16 sps:$4 sm:$0xff]   ;;  %v1077_v7 = vld [vmem:[#allocation8 + $0x2ec] ss:$16 sps:$4 sm:$0xff]  }
  0x48   :  { %717 = vmatprep.subr.bf16.mxu1 %v1005_v23  ;;  %v77_v50 = vld [vmem:[#allocation5] sm:$0xff]  ;;  %v1051_v56 = vld [vmem:[#allocation8 + $0x160] ss:$16 sps:$4 sm:$0xff]   ;;  %v1080_v11 = vld [vmem:[#allocation8 + $0x1cc] ss:$16 sps:$4 sm:$0xff]  }
  0x49   :  { %v1046_v52 = vld [vmem:[#allocation8 + $0x164] ss:$16 sps:$4 sm:$0xff]   ;;  %v864_v53 = vcombine.high %v77_v50, %v77_v50  ;;  %v1057_v60 = vld [vmem:[#allocation8 + $0x140] ss:$16 sps:$4 sm:$0xff]   ;;  %v1253_v8 = vcombine.low %v77_v50, %v77_v50  ;;  %v1072_v9 = vld [vmem:[#allocation8 + $0x1e8] ss:$16 sps:$4 sm:$0xff]  }
  0x4a   :  { %677 = vmatpush1.bf16.msra.mxu0 %v1007_v24  ;;  %v1052_v57 = vld [vmem:[#allocation8 + $0x144] ss:$16 sps:$4 sm:$0xff]   ;;  %v1063_v0 = vld [vmem:[#allocation8 + $0x120] ss:$16 sps:$4 sm:$0xff]   ;;  %v1075_v10 = vld [vmem:[#allocation8 + $0x2e8] ss:$16 sps:$4 sm:$0xff]  }
  0x4b   :  { %718 = vmatpush1.bf16.msra.mxu1 %v1008_v25  ;;  %678 = vmatprep.subr.bf16.mxu0 %v1009_v26  ;;  %v1058_v61 = vld [vmem:[#allocation8 + $0x124] ss:$16 sps:$4 sm:$0xff]   ;;  %v1069_v5 = vld [vmem:[#allocation8 + $0x100] ss:$16 sps:$4 sm:$0xff]   ;;  %v1083_v12 = vld [vmem:[#allocation8 + $0x2cc] ss:$16 sps:$4 sm:$0xff]  }
  0x4c   :  { %719 = vmatprep.subr.bf16.mxu1 %v1011_v27  ;;  %698 = vmatprep.mubr.bf16.mxu0 %v864_v53  ;;  %v1064_v1 = vld [vmem:[#allocation8 + $0x104] ss:$16 sps:$4 sm:$0xff]   ;;  %v1078_v13 = vld [vmem:[#allocation8 + $0x1c8] ss:$16 sps:$4 sm:$0xff]   ;;  %v1086_v15 = vld [vmem:[#allocation8 + $0x1ac] ss:$16 sps:$4 sm:$0xff]  }
  0x4d   :  { %v1081_v14 = vld [vmem:[#allocation8 + $0x2c8] ss:$16 sps:$4 sm:$0xff]   ;;  %v1089_v16 = vld [vmem:[#allocation8 + $0x2ac] ss:$16 sps:$4 sm:$0xff]  }
  0x4e   :  { %679 = vmatpush1.bf16.msra.mxu0 %v1013_v28  ;;  %v1084_v17 = vld [vmem:[#allocation8 + $0x1a8] ss:$16 sps:$4 sm:$0xff]   ;;  %v1092_v19 = vld [vmem:[#allocation8 + $0x18c] ss:$16 sps:$4 sm:$0xff]  }
  0x4f   :  { %720 = vmatpush1.bf16.msra.mxu1 %v1014_v29  ;;  %680 = vmatprep.subr.bf16.mxu0 %v1015_v30  ;;  %v1087_v18 = vld [vmem:[#allocation8 + $0x2a8] ss:$16 sps:$4 sm:$0xff]   ;;  %v1095_v20 = vld [vmem:[#allocation8 + $0x28c] ss:$16 sps:$4 sm:$0xff]  }
  0x50   :  { %721 = vmatprep.subr.bf16.mxu1 %v1017_v31  ;;  %v1090_v21 = vld [vmem:[#allocation8 + $0x188] ss:$16 sps:$4 sm:$0xff]   ;;  %v1098_v23 = vld [vmem:[#allocation8 + $0x16c] ss:$16 sps:$4 sm:$0xff]  }
  0x51   :  { %v1093_v22 = vld [vmem:[#allocation8 + $0x288] ss:$16 sps:$4 sm:$0xff]   ;;  %v1101_v24 = vld [vmem:[#allocation8 + $0x26c] ss:$16 sps:$4 sm:$0xff]  }
  0x52   :  { %681 = vmatpush1.bf16.msra.mxu0 %v1019_v32  ;;  %v1096_v25 = vld [vmem:[#allocation8 + $0x168] ss:$16 sps:$4 sm:$0xff]   ;;  %v1104_v26 = vld [vmem:[#allocation8 + $0x14c] ss:$16 sps:$4 sm:$0xff]  }
  0x53   :  { %722 = vmatpush1.bf16.msra.mxu1 %v1020_v33  ;;  %682 = vmatprep.subr.bf16.mxu0 %v1021_v34  ;;  %v1107_v27 = vld [vmem:[#allocation8 + $0x24c] ss:$16 sps:$4 sm:$0xff]   ;;  %v1102_v28 = vld [vmem:[#allocation8 + $0x148] ss:$16 sps:$4 sm:$0xff]  }
  0x54   :  { %748 = vmatprep.subr.bf16.mxu1 %v1026_v35  ;;  %v1105_v29 = vld [vmem:[#allocation8 + $0x248] ss:$16 sps:$4 sm:$0xff]   ;;  %v1110_v30 = vld [vmem:[#allocation8 + $0x12c] ss:$16 sps:$4 sm:$0xff]  }
  0x55   :  { %v1113_v31 = vld [vmem:[#allocation8 + $0x22c] ss:$16 sps:$4 sm:$0xff]   ;;  %v1108_v32 = vld [vmem:[#allocation8 + $0x128] ss:$16 sps:$4 sm:$0xff]  }
  0x56   :  { %740 = vmatmul.mubr.bf16.vlgmr.msra.gmra.mxu1 %v1250_v36  ;;  %683 = vmatpush2.bf16.msra.mxu0 %v1027_v38  ;;  %v1111_v33 = vld [vmem:[#allocation8 + $0x228] ss:$16 sps:$4 sm:$0xff]   ;;  %v1116_v34 = vld [vmem:[#allocation8 + $0x10c] ss:$16 sps:$4 sm:$0xff]  }
  0x57   :  { %749 = vmatpush1.bf16.msra.mxu1 %v1024_v37  ;;  %684 = vmatprep.subr.bf16.mxu0 %v1028_v39  ;;  %v1119_v35 = vld [vmem:[#allocation8 + $0x20c] ss:$16 sps:$4 sm:$0xff]   ;;  %v1114_v37 = vld [vmem:[#allocation8 + $0x108] ss:$16 sps:$4 sm:$0xff]  }
  0x58   :  { %750 = vmatprep.subr.bf16.mxu1 %v1032_v40  ;;  %780 = vmatprep.mubr.bf16.mxu1 %v864_v53  ;;  %v1117_v38 = vld [vmem:[#allocation8 + $0x208] ss:$16 sps:$4 sm:$0xff]  }
  0x5a   :  { %685 = vmatpush2.bf16.msra.mxu0 %v1033_v42 }
  0x5b   :  { %751 = vmatpush1.bf16.msra.mxu1 %v1030_v41  ;;  %686 = vmatprep.subr.bf16.mxu0 %v1034_v43  ;;  %v73_v43 = vld [vmem:[#allocation10] sm:$0xff] }
  0x5c   :  { %752 = vmatprep.subr.bf16.mxu1 %v1038_v44 }
  0x5e   :  { %687 = vmatpush2.bf16.msra.mxu0 %v1039_v46  ;;  %v74_v46 = vld [vmem:[#allocation10 + $0x8] sm:$0xff] }
  0x5f   :  { %753 = vmatpush1.bf16.msra.mxu1 %v1036_v45  ;;  %688 = vmatprep.subr.bf16.mxu0 %v1040_v47 }
  0x60   :  { %754 = vmatprep.subr.bf16.mxu1 %v1044_v48 }
  0x62   :  { %689 = vmatpush2.bf16.msra.mxu0 %v1045_v51 }
  0x63   :  { %755 = vmatpush1.bf16.msra.mxu1 %v1042_v49  ;;  %690 = vmatprep.subr.bf16.mxu0 %v1046_v52 }
  0x64   :  { %756 = vmatprep.subr.bf16.mxu1 %v1050_v54  ;;  %v75_v54 = vld [vmem:[#allocation10 + $0x10] sm:$0xff] }
  0x66   :  { %691 = vmatpush2.bf16.msra.mxu0 %v1051_v56 }
  0x67   :  { %757 = vmatpush1.bf16.msra.mxu1 %v1048_v55  ;;  %692 = vmatprep.subr.bf16.mxu0 %v1052_v57  ;;  %v76_v57 = vld [vmem:[#allocation10 + $0x18] sm:$0xff] }
  0x68   :  { %758 = vmatprep.subr.bf16.mxu1 %v1056_v58 }
  0x6a   :  { %693 = vmatpush2.bf16.msra.mxu0 %v1057_v60 }
  0x6b   :  { %759 = vmatpush1.bf16.msra.mxu1 %v1054_v59  ;;  %694 = vmatprep.subr.bf16.mxu0 %v1058_v61 }
  0x6c   :  { %760 = vmatprep.subr.bf16.mxu1 %v1062_v62 }
  0x6e   :  { %695 = vmatpush2.bf16.msra.mxu0 %v1063_v0 }
  0x6f   :  { %761 = vmatpush1.bf16.msra.mxu1 %v1060_v63  ;;  %696 = vmatprep.subr.bf16.mxu0 %v1064_v1 }
  0x70   :  { %762 = vmatprep.subr.bf16.mxu1 %v1068_v2 }
  0x72   :  { %697 = vmatpush2.bf16.msra.mxu0 %v1069_v5 }
  0x73   :  { %763 = vmatpush1.bf16.msra.mxu1 %v1066_v4  ;;  %789 = vmatprep.subr.bf16.mxu0 %v1077_v7 }
  0x74   :  { %764 = vmatprep.subr.bf16.mxu1 %v1074_v6 }
  0x75   :  { %699 = vmatmul.mubr.bf16.vlgmr.msra.gmra.mxu0 %v1253_v8 }
  0x76   :  { %790 = vmatpush1.bf16.msra.mxu0 %v1075_v10  ;;  %821 = vmatprep.mubr.bf16.mxu0 %v1195_v3  ;;  %v1099_v3 = vld [vmem:[#allocation8 + $0x268] ss:$16 sps:$4 sm:$0xff]  }
  0x77   :  { %765 = vmatpush2.bf16.msra.mxu1 %v1072_v9  ;;  %791 = vmatprep.subr.bf16.mxu0 %v1083_v12 }
  0x78   :  { %766 = vmatprep.subr.bf16.mxu1 %v1080_v11 }
  0x7a   :  { %792 = vmatpush1.bf16.msra.mxu0 %v1081_v14 }
  0x7b   :  { %767 = vmatpush2.bf16.msra.mxu1 %v1078_v13  ;;  %793 = vmatprep.subr.bf16.mxu0 %v1089_v16 }
  0x7c   :  { %768 = vmatprep.subr.bf16.mxu1 %v1086_v15 }
  0x7e   :  { %794 = vmatpush1.bf16.msra.mxu0 %v1087_v18 }
  0x7f   :  { %769 = vmatpush2.bf16.msra.mxu1 %v1084_v17  ;;  %795 = vmatprep.subr.bf16.mxu0 %v1095_v20 }
  0x80   :  { %770 = vmatprep.subr.bf16.mxu1 %v1092_v19 }
  0x82   :  { %796 = vmatpush1.bf16.msra.mxu0 %v1093_v22 }
  0x83   :  { %771 = vmatpush2.bf16.msra.mxu1 %v1090_v21  ;;  %797 = vmatprep.subr.bf16.mxu0 %v1101_v24 }
  0x84   :  { %772 = vmatprep.subr.bf16.mxu1 %v1098_v23 }
  0x86   :  { %798 = vmatpush1.bf16.msra.mxu0 %v1099_v3 }
  0x87   :  { %773 = vmatpush2.bf16.msra.mxu1 %v1096_v25  ;;  %799 = vmatprep.subr.bf16.mxu0 %v1107_v27 }
  0x88   :  { %774 = vmatprep.subr.bf16.mxu1 %v1104_v26 }
  0x8a   :  { %800 = vmatpush1.bf16.msra.mxu0 %v1105_v29 }
  0x8b   :  { %775 = vmatpush2.bf16.msra.mxu1 %v1102_v28  ;;  %801 = vmatprep.subr.bf16.mxu0 %v1113_v31 }
  0x8c   :  { %776 = vmatprep.subr.bf16.mxu1 %v1110_v30 }
  0x8e   :  { %802 = vmatpush1.bf16.msra.mxu0 %v1111_v33 }
  0x8f   :  { %777 = vmatpush2.bf16.msra.mxu1 %v1108_v32  ;;  %803 = vmatprep.subr.bf16.mxu0 %v1119_v35 }
  0x90   :  { %778 = vmatprep.subr.bf16.mxu1 %v1116_v34 }
  0x92   :  { %804 = vmatpush1.bf16.msra.mxu0 %v1117_v38 }
  0x93   :  { %779 = vmatpush2.bf16.msra.mxu1 %v1114_v37 }
  0x95   :  { %822 = vmatmul.mubr.bf16.vlgmr.msra.gmra.mxu0 %v1250_v36 }
  0x96   :  { %781 = vmatmul.mubr.bf16.vlgmr.msra.gmra.mxu1 %v1253_v8 }
 0x116   :  { %v741_v39 = vpop.f32.mrf.mxu1 }
 0x118   :  { %v743_v40 = vpop.f32.mrf.mxu1 }
 0x11a   :  { %v745_v41 = vpop.f32.mrf.mxu1 }
 0x11c   :  { %v746_v42 = vpop.f32.mrf.mxu1 }
 0x135   :  { %v700_v44 = vpop.f32.mrf.mxu0 }
 0x136   :  { %v742_v45 = vadd.f32 %v741_v39, %v700_v44 }
 0x137   :  { %v702_v47 = vpop.f32.mrf.mxu0 }
 0x138   :  { %v830_v48 = vadd.f32 %v742_v45, %v73_v43  ;;  %v744_v49 = vadd.f32 %v743_v40, %v702_v47 }
 0x139   :  { %v704_v50 = vpop.f32.mrf.mxu0 }
 0x13a   :  { %834 = vst [vmem:[#allocation10] sm:$0xff] %v830_v48  ;;  %v831_v51 = vadd.f32 %v744_v49, %v74_v46 }
 0x13b   :  { %v705_v52 = vpop.f32.mrf.mxu0 }
 0x13c   :  { %835 = vst [vmem:[#allocation10 + $0x8] sm:$0xff] %v831_v51 }
 0x155   :  { %v823_v55 = vpop.f32.mrf.mxu0 }
 0x156   :  { %v782_v53 = vpop.f32.mrf.mxu1 }
 0x157   :  { %v824_v36 = vadd.f32 %v823_v55, %v782_v53  ;;  %v825_v58 = vpop.f32.mrf.mxu0 }
 0x158   :  { %v784_v56 = vpop.f32.mrf.mxu1 }
 0x159   :  { %v832_v59 = vadd.f32 %v824_v36, %v75_v54  ;;  %v826_v60 = vadd.f32 %v825_v58, %v784_v56  ;;  %v827_v62 = vpop.f32.mrf.mxu0 }
 0x15a   :  { %v786_v61 = vpop.f32.mrf.mxu1 }
 0x15b   :  { %836 = vst [vmem:[#allocation10 + $0x10] sm:$0xff] %v832_v59  ;;  %v833_v63 = vadd.f32 %v826_v60, %v76_v57  ;;  %v828_v1 = vpop.f32.mrf.mxu0 }
 0x15c   :  { %v787_v0 = vpop.f32.mrf.mxu1 }
 0x15d   :  { %837 = vst [vmem:[#allocation10 + $0x18] sm:$0xff] %v833_v63 }
 0x15e PF:  { %s1196_s1 = smov [#allocation10]  }
 0x15f   :  { %s844_s20 = sshll.u32 %s1196_s1, 4  ;;  %s845_s20 = int_to_ptr.vmem [resolvable:$true] %s844_s20 }
 0x160   :  { %s1164_s21 = scalar_lea.vmem %s845_s20, 512  ;;  %p1169_p8 = scmp.lt.s32.totalorder %s845_s20, %s845_s20 }
 0x161   :  { %p1165_p7 = scmp.ne.s32.totalorder %s845_s20, %s1164_s21  ;;  %p1170_p9 = scmp.lt.s32.totalorder %s1164_s21, %s1164_s21 }
 0x163   :  { %p1171_p10 = por %p1170_p9, %p1169_p8 }
 0x165   :  { %p1172_p11 = pnand %p1171_p10, %p1165_p7 }
 0x167   :  { %1175 = shalt.err (!%p1172_p11)
}
 0x168   :  { %847 = dma.vmem_to_hbm [thread:$0]  %s845_s20, 512, %s1266_s4, [#allocation7]  }
 0x169   :  { %1188 = dma.done.wait [#allocation7], 512  }
 0x16a   :  { %1189 = vsyncadd [#allocation7], 4294966784 }
 0x16b   :  { %851 = vsyncpa [#allocation6], 1 }
 0x16c   :  { %852 = vsyncpa [#allocation9], 1 }
 0x16d   :  { %853 = vsyncpa [#allocation7], 1 }

</bundles_post_ra>
